<compile_context>
chip_gen: v6e
topology: v6e:2x2x1
jax: 0.10.0
libtpu: 0.0.40
codegen_flags: <defaults>
</compile_context>

<pallas_src>
import math
import functools

import jax
import jax.numpy as jnp
from jax.experimental import pallas as pl
from jax.experimental.pallas import tpu as pltpu


def _controller_kernel(x_ref, w_ref, sel_ref, probs_ref, hl_ref, *, C, inv_temp):
    # x_ref:    (TB, R, D)        R = nh*C, rows ordered (tb, h, c)
    # w_ref:    (E, D)            nn.Linear weight (out, in), resident
    # sel_ref:  (TB*R, TB*C)      0/1 head-sum selector, resident
    # probs_ref:(E, TB*R)         lane-dense softmax output
    # hl_ref:   (TB, E, C)        head_likelihood (transposed layout)
    TB, R, D = x_ref.shape
    x = x_ref[...].reshape(TB * R, D)            # merge leading dims (free)
    w = w_ref[...]                               # (E, D)

    # Lane-dense logits (E, TB*R); contraction over D on both operands, so no
    # explicit transpose of either operand is needed.
    logits = jax.lax.dot_general(
        w, x, dimension_numbers=(((1,), (1,)), ((), ())),
        preferred_element_type=jnp.float32)
    if inv_temp != 1.0:
        logits = logits * inv_temp               # static scale, not a divide

    # Softmax over the expert axis == sublane axis (8 sublanes).
    m = jnp.max(logits, axis=0, keepdims=True)   # (1, TB*R)
    z = logits - m
    ez = jnp.exp(z)                              # EUP, one vreg per TB
    s = jnp.sum(ez, axis=0, keepdims=True)       # (1, TB*R)
    r = pl.reciprocal(s, approx=True)            # EUP slot (no VPU divide)
    r = r * (2.0 - s * r)                        # one Newton step -> ~f32 exact
    probs_ref[...] = ez * r                      # lane-dense store (E, TB*R)

    logprobs = z - jnp.log(s)                    # log-softmax, (E, TB*R)

    # Sum of log-probs over heads as one tiny MXU matmul:
    #   hl[e, tb*C + c] = sum_h logprobs[e, tb*R + h*C + c]
    hl = jnp.exp(jnp.dot(logprobs, sel_ref[...],
                         preferred_element_type=jnp.float32))   # (E, TB*C)
    for tb in range(TB):                         # TB static & tiny (1 in demo)
        hl_ref[tb] = hl[:, tb * C:(tb + 1) * C]


def controller_layer3_forward(x, weight, *, temperature=1.0, n=4, batch_block=None):
    """x: (B, nh, C, D) float32, weight: (E, D) float32.  Returns dict."""
    B, nh, C, D = x.shape
    E = weight.shape[0]
    assert E == nh, "router_selections gather in the reference requires output_dim == nh"
    assert E % n == 0
    R = nh * C

    # Pick TB batches per program: amortize per-step overhead but keep >=2
    # programs so both v7x TensorCores can be used via the parallel grid axis.
    if batch_block is None:
        if B >= 2:
            tb = B // 2
            while B % tb:
                tb -= 1
            batch_block = tb
        else:
            batch_block = B
    TB = batch_block
    assert B % TB == 0
    grid = (B // TB,)

    x_flat = x.reshape(B, R, D)

    # 0/1 selector: sel[tb*R + h*C + c, tb*C + c] = 1  (sums log-probs over h).
    rows = jnp.arange(TB * R)
    cols = jnp.arange(TB * C)
    sel = ((rows[:, None] // R == cols[None, :] // C)
           & (rows[:, None] % C == cols[None, :] % C)).astype(jnp.float32)

    kernel = functools.partial(
        _controller_kernel, C=C, inv_temp=float(1.0 / float(temperature)))

    probs_t, hl_t = pl.pallas_call(
        kernel,
        out_shape=(
            jax.ShapeDtypeStruct((E, B * R), jnp.float32),   # lane-dense probs
            jax.ShapeDtypeStruct((B, E, C), jnp.float32),    # head_likelihood^T
        ),
        grid_spec=pltpu.PrefetchScalarGridSpec(
            num_scalar_prefetch=0,
            grid=grid,
            in_specs=[
                pl.BlockSpec((TB, R, D), lambda b: (b, 0, 0)),
                pl.BlockSpec((E, D), lambda b: (0, 0)),            # resident
                pl.BlockSpec((TB * R, TB * C), lambda b: (0, 0)),  # resident
            ],
            out_specs=[
                pl.BlockSpec((E, TB * R), lambda b: (0, b)),
                pl.BlockSpec((TB, E, C), lambda b: (b, 0, 0)),
            ],
        ),
        compiler_params=pltpu.CompilerParams(
            dimension_semantics=("parallel",)),
    )(x_flat, weight, sel)

    # Layout plumbing back to the PyTorch layout (wrapper-side, cheap).
    probs = jnp.transpose(probs_t.reshape(E, B, nh, C), (1, 2, 3, 0))  # (B,nh,C,E)
    head_likelihood = jnp.transpose(hl_t, (0, 2, 1))                   # (B,C,E)

    # groups = argsort(head_likelihood, descending) along experts
    groups = jnp.argsort(-head_likelihood, axis=-1)                    # (B,C,E)

    # probs_sorted[b,h,c,e] = probs[b,h,c,groups[b,c,e]]
    probs_sorted = jnp.take_along_axis(
        probs, jnp.broadcast_to(groups[:, None, :, :], (B, nh, C, E)), axis=-1)

    # router_selections[b,h,c,g,j,d] = x[b, groups[b,c,g*n+j], c, d]
    xt = jnp.transpose(x, (0, 2, 1, 3))                                # (B,C,nh,D)
    gathered = jnp.take_along_axis(
        xt, jnp.broadcast_to(groups[..., None], (B, C, E, 1)), axis=2)  # (B,C,E,D)
    gathered = gathered.reshape(B, C, E // n, n, D)
    router_selections = jnp.broadcast_to(
        gathered[:, None], (B, nh, C, E // n, n, D))

    return {
        "logits_probs": probs,
        "head_likelihood": head_likelihood,
        "groups": groups,
        "probs_sorted": probs_sorted,
        "router_selections": router_selections,
    }


def _reference(x, weight, temperature=1.0):
    logits = jnp.einsum("bhcd,ed->bhce", x, weight)
    if temperature != 1.0:
        logits = logits / temperature
    probs = jax.nn.softmax(logits, axis=-1)
    hl = jnp.exp(jnp.sum(jnp.log(probs), axis=1))
    return probs, hl


if __name__ == "__main__":
    B, nh, C, D = 2, 8, 16, 32
    E = nh          # output_dim must equal nh for the reference gather to be valid
    temperature = 1.0

    key = jax.random.PRNGKey(0)
    kx, kw = jax.random.split(key)
    x = jax.random.normal(kx, (B, nh, C, D), dtype=jnp.float32)
    weight = jax.random.normal(kw, (E, D), dtype=jnp.float32) * (1.0 / math.sqrt(D))

    out = controller_layer3_forward(x, weight, temperature=temperature, n=4)
    jax.tree_util.tree_map(jax.block_until_ready, out)

    # Correctness check against a pure-JAX reference for the kernel-computed parts.
    probs_ref, hl_ref = _reference(x, weight, temperature)
    assert jnp.allclose(out["logits_probs"], probs_ref, atol=1e-4, rtol=1e-4)
    assert jnp.allclose(out["head_likelihood"], hl_ref, atol=1e-4, rtol=1e-4)

    print("KERNEL_OK")
</pallas_src>

<mosaic_0001>
module attributes {stable_mosaic.version = 11 : i64} {
  func.func @_controller_kernel(%arg0: i32, %arg1: memref<1x128x32xf32, #tpu.memory_space<vmem>>, %arg2: memref<8x32xf32, #tpu.memory_space<vmem>>, %arg3: memref<128x16xf32, #tpu.memory_space<vmem>>, %arg4: memref<8x128xf32, #tpu.memory_space<vmem>>, %arg5: memref<1x8x16xf32, #tpu.memory_space<vmem>>) attributes {dimension_semantics = [#tpu.dimension_semantics<parallel>], iteration_bounds = array<i64: 2>, scalar_prefetch = 0 : i64, scratch_operands = 0 : i64, tpu.core_type = #tpu.core_type<tc>, window_params = [{transform_indices = @transform_0, window_bounds = array<i64: 1, 128, 32>}, {pipeline_mode = #tpu.pipeline_mode<synchronous>, transform_indices = @transform_1, window_bounds = array<i64: 8, 32>}, {pipeline_mode = #tpu.pipeline_mode<synchronous>, transform_indices = @transform_2, window_bounds = array<i64: 128, 16>}, {transform_indices = @transform_3, window_bounds = array<i64: 8, 128>}, {transform_indices = @transform_4, window_bounds = array<i64: 1, 8, 16>}]} {
    %c0 = arith.constant 0 : index
    %c0_0 = arith.constant 0 : index
    %c0_1 = arith.constant 0 : index
    %0 = vector.load %arg1[%c0, %c0_0, %c0_1] : memref<1x128x32xf32, #tpu.memory_space<vmem>>, vector<1x128x32xf32>
    %1 = vector.shape_cast %0 : vector<1x128x32xf32> to vector<128x32xf32>
    %c0_2 = arith.constant 0 : index
    %c0_3 = arith.constant 0 : index
    %2 = vector.load %arg2[%c0_2, %c0_3] : memref<8x32xf32, #tpu.memory_space<vmem>>, vector<8x32xf32>
    %cst = arith.constant dense<0.000000e+00> : vector<8x128xf32>
    %3 = tpu.matmul %2, %1, %cst {dimension_numbers = #tpu.dot_dimension_numbers<[1], [1], [0], [0], [0, 0, 1, 0], [], []>} : vector<8x32xf32>, vector<128x32xf32>, vector<8x128xf32> -> vector<8x128xf32>
    %cst_4 = arith.constant dense<0xFF800000> : vector<128xf32>
    %4 = vector.multi_reduction <maximumf>, %3, %cst_4 [0] : vector<8x128xf32> to vector<128xf32>
    %5 = vector.shape_cast %4 : vector<128xf32> to vector<1x128xf32>
    %6 = vector.broadcast %5 : vector<1x128xf32> to vector<8x128xf32>
    %7 = arith.subf %3, %6 : vector<8x128xf32>
    %8 = math.exp %7 : vector<8x128xf32>
    %cst_5 = arith.constant dense<0.000000e+00> : vector<128xf32>
    %9 = vector.multi_reduction <add>, %8, %cst_5 [0] : vector<8x128xf32> to vector<128xf32>
    %10 = vector.shape_cast %9 : vector<128xf32> to vector<1x128xf32>
    %11 = tpu.reciprocal %10 {approx = true} : vector<1x128xf32> -> vector<1x128xf32>
    %12 = arith.mulf %10, %11 : vector<1x128xf32>
    %cst_6 = arith.constant 2.000000e+00 : f32
    %13 = vector.broadcast %cst_6 : f32 to vector<1x128xf32>
    %14 = arith.subf %13, %12 : vector<1x128xf32>
    %15 = arith.mulf %11, %14 : vector<1x128xf32>
    %16 = vector.broadcast %15 : vector<1x128xf32> to vector<8x128xf32>
    %17 = arith.mulf %8, %16 : vector<8x128xf32>
    %c0_7 = arith.constant 0 : index
    %c0_8 = arith.constant 0 : index
    %18 = vector.load %arg4[%c0_7, %c0_8] : memref<8x128xf32, #tpu.memory_space<vmem>>, vector<8x128xf32>
    tpu.vector_store %arg4[%c0_7, %c0_8], %17 {strides = array<i32>} : memref<8x128xf32, #tpu.memory_space<vmem>>, vector<8x128xf32>,
    %19 = math.log %10 : vector<1x128xf32>
    %20 = vector.broadcast %19 : vector<1x128xf32> to vector<8x128xf32>
    %21 = arith.subf %7, %20 : vector<8x128xf32>
    %c0_9 = arith.constant 0 : index
    %c0_10 = arith.constant 0 : index
    %22 = vector.load %arg3[%c0_9, %c0_10] : memref<128x16xf32, #tpu.memory_space<vmem>>, vector<128x16xf32>
    %cst_11 = arith.constant dense<0.000000e+00> : vector<8x16xf32>
    %23 = tpu.matmul %21, %22, %cst_11 {dimension_numbers = #tpu.dot_dimension_numbers<[1], [0], [0], [1], [0, 0, 1, 1], [], []>} : vector<8x128xf32>, vector<128x16xf32>, vector<8x16xf32> -> vector<8x16xf32>
    %24 = math.exp %23 : vector<8x16xf32>
    %c0_12 = arith.constant 0 : index
    %c0_13 = arith.constant 0 : index
    %c0_14 = arith.constant 0 : index
    %25 = vector.load %arg5[%c0_12, %c0_13, %c0_14] : memref<1x8x16xf32, #tpu.memory_space<vmem>>, vector<1x8x16xf32>
    %26 = vector.shape_cast %25 : vector<1x8x16xf32> to vector<8x16xf32>
    %27 = vector.shape_cast %24 : vector<8x16xf32> to vector<1x8x16xf32>
    tpu.vector_store %arg5[%c0_12, %c0_13, %c0_14], %27 {strides = array<i32>} : memref<1x8x16xf32, #tpu.memory_space<vmem>>, vector<1x8x16xf32>,
    return
  }
  func.func @transform_0(%arg0: i32) -> (i32, i32, i32) {
    %c0_i32 = arith.constant 0 : i32
    %c0_i32_0 = arith.constant 0 : i32
    %c0_i32_1 = arith.constant 0 : i32
    return %arg0, %c0_i32, %c0_i32_0 : i32, i32, i32
  }
  func.func @transform_1(%arg0: i32) -> (i32, i32) {
    %c0_i32 = arith.constant 0 : i32
    %c0_i32_0 = arith.constant 0 : i32
    %c0_i32_1 = arith.constant 0 : i32
    return %c0_i32, %c0_i32_0 : i32, i32
  }
  func.func @transform_2(%arg0: i32) -> (i32, i32) {
    %c0_i32 = arith.constant 0 : i32
    %c0_i32_0 = arith.constant 0 : i32
    %c0_i32_1 = arith.constant 0 : i32
    return %c0_i32, %c0_i32_0 : i32, i32
  }
  func.func @transform_3(%arg0: i32) -> (i32, i32) {
    %c0_i32 = arith.constant 0 : i32
    %c0_i32_0 = arith.constant 0 : i32
    return %c0_i32, %arg0 : i32, i32
  }
  func.func @transform_4(%arg0: i32) -> (i32, i32, i32) {
    %c0_i32 = arith.constant 0 : i32
    %c0_i32_0 = arith.constant 0 : i32
    %c0_i32_1 = arith.constant 0 : i32
    return %arg0, %c0_i32, %c0_i32_0 : i32, i32, i32
  }
}

</mosaic_0001>

<bundles_post_ra>
// kernel: tpu_custom_call.1
= control target key start
LH: loop header
LB: loop body
LE: loop exit
PB: predicated region body
PF: predicated region fallthrough
CT: control target
= control target key end

     0   :  { %10 = vsyncpa [#allocation3], 0  ;;  %s1135_s0 = inlined_call_operand.vmem [shape: f32[2,128,32], index: 0, kind: input, shape index: {}]   ;;  %s1136_s1 = inlined_call_operand.vmem [shape: f32[8,32], index: 1, kind: input, shape index: {}]   ;;  %s1137_s2 = inlined_call_operand.vmem [shape: f32[128,16], index: 2, kind: input, shape index: {}]   ;;  %s1138_s3 = inlined_call_operand.hbm [shape: f32[8,256], index: 3, kind: output, shape index: {0}]   ;;  %s1139_s4 = inlined_call_operand.hbm [shape: f32[2,8,16], index: 4, kind: output, shape index: {1}]  }
   0x1   :  { %12 = vsyncpa [#allocation3 + $0x1], 0 }
   0x2   :  { %13 = vsyncpa [#allocation5], 0 }
   0x3   :  { %15 = vsyncpa [#allocation5 + $0x1], 0  ;;  %s894_s15 = smov 0   ;;  %s896_s16 = smov 0  }
   0x4   :  { %s898_s17 = smov 0   ;;  %s900_s18 = smov 0  }
   0x5 LB: > { %s915_s19 = sadd.s32 4294967295, %s863_s18   ;;  %s583_s20 = sadd.s32 4294967294, %s863_s18   ;;  %s863_s18 = sphi %s900_s18, %s1145_s18   ;;  %s859_s17 = sphi %s898_s17, %s1144_s17   ;;  %s855_s16 = sphi %s896_s16, %s1143_s16   ;;  %s851_s15 = sphi %s894_s15, %s1142_s15  }
   0x6   : > { %s919_s21 = sadd.s32 1, %s863_s18   ;;  %s96_s22 = sadd.s32 1, %s859_s17 }
   0x7   : > { %s93_s23 = ssub.s32 %s863_s18, %s919_s21  ;;  %p106_p0 = scmp.ne.s32.totalorder %s859_s17, %s855_s16 }
   0x8   : > { %p94_p1 = scmp.eq.s32.totalorder %s93_s23, 0  ;;  %p107_p2 = scmp.eq.s32.totalorder %s915_s19, 1 }
   0x9   : > { %p112_p3 = scmp.ne.s32.totalorder %s855_s16, %s851_s15  ;;  %p113_p4 = scmp.eq.s32.totalorder %s583_s20, 1 }
   0xa   : > { %s930_s24 = scalar_select %p94_p1, %s859_s17, %s96_s22  }
   0xb   : > { %p932_p5 = por %p107_p2, %p106_p0  ;;  %p936_p6 = por %p113_p4, %p112_p3 }
   0xc   : > { %p586_p7 = scmp.ge.s32.totalorder %s863_s18, 1  ;;  %p171_p8 = scmp.lt.s32.totalorder %s863_s18, 3 }
   0xe   : > { %p172_p9 = pnand %p586_p7, %p171_p8 }
   0xf   : > { %p202_p10 = scmp.lt.s32.totalorder (!%p172_p9), %s915_s19, 1  ;;  %s1068_s6 = sand.u32 (!%p172_p9), 1, %s855_s16  }
  0x10   : > { %175 = sbr.rel (%p172_p9) target bundleno = 565 (0x235), region = 32  ;;  %s587_s7 = sshll.u32 (!%p172_p9), %s1068_s6, 3 }
  0x11   : > { %s194_s8 = scalar_lea.vmem (!%p172_p9), [#allocation2], %s587_s7  ;;  %s610_s9 = sshll.u32 (!%p172_p9), %s915_s19, 7 }
  0x12   : > { %s477_s12 = scalar_lea.hbm (!%p172_p9), %s1138_s3, %s610_s9  ;;  %s479_s13 = sshll.u32 (!%p172_p9), %s194_s8, 4  ;;  %s480_s13 = int_to_ptr.vmem [resolvable:$true] %s479_s13 }
  0x13   : > { %s461_s14 = scalar_lea.sflag (!%p172_p9), [#allocation3], %s1068_s6  ;;  %s773_s20 = scalar_lea.vmem (!%p172_p9), %s480_s13, 128 }
  0x14   : > { %p774_p11 = scmp.ne.s32.totalorder (!%p172_p9), %s480_s13, %s773_s20  ;;  %s867_s22 = smov (!%p172_p9), [#allocation2]  }
  0x15   : > { %v865_v0 = vmov 0.0   ;;  %vm866_vm0 = vmmov 0   ;;  %s203_s27 = scalar_select %p202_p10, %s915_s19, 1  ;;  %vm224_vm1 = vcmask 261120   ;;  %v223_v17 = vld [vmem:[%s1136_s1] sm:$0xff]  ;;  %v385_v18 = vld [vmem:[%s1137_s2 + $0x78] sm:$0xff] }
  0x16   : > { %649 = vmatprep.subr.mxu0 %v865_v0  ;;  %681 = vmatprep.mubr.msk.f32.mxu0 %vm866_vm0, %v865_v0  ;;  %v384_v19 = vld [vmem:[%s1137_s2 + $0x70] sm:$0xff]  ;;  %v383_v20 = vld [vmem:[%s1137_s2 + $0x68] sm:$0xff]  ;;  %v382_v21 = vld [vmem:[%s1137_s2 + $0x60] sm:$0xff]  ;;  %p775_p12 = pnand %p774_p11, %p932_p5  ;;  %s777_s23 = sshll.u32 %s867_s22, 4  ;;  %s778_s23 = int_to_ptr.vmem [resolvable:$false] %s777_s23 }
  0x17   : > { %684 = vmatprep.subr.mxu1 %v865_v0  ;;  %716 = vmatprep.mubr.msk.f32.mxu1 %vm866_vm0, %v865_v0  ;;  %s614_s28 = sshll.u32 %s203_s27, 7  ;;  %v381_v22 = vld [vmem:[%s1137_s2 + $0x58] sm:$0xff]  ;;  %v380_v23 = vld [vmem:[%s1137_s2 + $0x50] sm:$0xff]  ;;  %v379_v24 = vld [vmem:[%s1137_s2 + $0x48] sm:$0xff]  ;;  %s779_s27 = scalar_lea.vmem %s778_s23, 256 }
  0x18   : > { %s951_s5 = scalar_lea.vmem %s1135_s0, %s614_s28  ;;  %685 = vmatpush3.msra.mxu1 %v385_v18  ;;  %v378_v25 = vld [vmem:[%s1137_s2 + $0x40] sm:$0xff]  ;;  %v377_v26 = vld [vmem:[%s1137_s2 + $0x38] sm:$0xff]  ;;  %v376_v27 = vld [vmem:[%s1137_s2 + $0x30] sm:$0xff]  ;;  %p776_p13 = pneg %p775_p12 }
  0x19   : > { %v222_v1 = vld [vmem:[%s951_s5 + $0x78] sm:$0xff]  ;;  %v221_v2 = vld [vmem:[%s951_s5 + $0x70] sm:$0xff]  ;;  %v220_v3 = vld [vmem:[%s951_s5 + $0x68] sm:$0xff]  ;;  %686 = vmatprep.subr.mxu1 %v865_v0  ;;  %p780_p0 = scmp.lt.s32.totalorder %s480_s13, %s778_s23  ;;  %p781_p1 = scmp.lt.s32.totalorder %s779_s27, %s773_s20 }
  0x1a   : > { %650 = vmatpush3.xpose.msk.msra.mxu0 %vm224_vm1, %v222_v1  ;;  %v219_v4 = vld [vmem:[%s951_s5 + $0x60] sm:$0xff]  ;;  %v218_v5 = vld [vmem:[%s951_s5 + $0x58] sm:$0xff]  ;;  %v217_v6 = vld [vmem:[%s951_s5 + $0x50] sm:$0xff]  ;;  %687 = vmatpush3.msra.mxu1 %v384_v19 }
  0x1b   : > { %651 = vmatprep.subr.mxu0 %v865_v0  ;;  %v216_v7 = vld [vmem:[%s951_s5 + $0x48] sm:$0xff]  ;;  %v215_v8 = vld [vmem:[%s951_s5 + $0x40] sm:$0xff]  ;;  %v214_v9 = vld [vmem:[%s951_s5 + $0x38] sm:$0xff]  ;;  %688 = vmatprep.subr.mxu1 %v865_v0  ;;  %p782_p2 = por %p781_p1, %p780_p0 }
  0x1c   : > { %v213_v10 = vld [vmem:[%s951_s5 + $0x30] sm:$0xff]  ;;  %v212_v11 = vld [vmem:[%s951_s5 + $0x28] sm:$0xff]  ;;  %v211_v12 = vld [vmem:[%s951_s5 + $0x20] sm:$0xff]  ;;  %689 = vmatpush3.msra.mxu1 %v383_v20 }
  0x1d   : > { %v210_v13 = vld [vmem:[%s951_s5 + $0x18] sm:$0xff]  ;;  %v209_v14 = vld [vmem:[%s951_s5 + $0x10] sm:$0xff]  ;;  %v208_v15 = vld [vmem:[%s951_s5 + $0x8] sm:$0xff]  ;;  %690 = vmatprep.subr.mxu1 %v865_v0  ;;  %p783_p3 = pnand %p782_p2, %p776_p13 }
  0x1e   : > { %652 = vmatpush3.xpose.msk.msra.mxu0 %vm224_vm1, %v221_v2  ;;  %v207_v16 = vld [vmem:[%s951_s5] sm:$0xff]  ;;  %691 = vmatpush3.msra.mxu1 %v382_v21  ;;  %v375_v28 = vld [vmem:[%s1137_s2 + $0x28] sm:$0xff]  ;;  %v373_v30 = vld [vmem:[%s1137_s2 + $0x18] sm:$0xff] }
  0x1f   : > { %653 = vmatprep.subr.mxu0 %v865_v0  ;;  %692 = vmatprep.subr.mxu1 %v865_v0  ;;  %v374_v29 = vld [vmem:[%s1137_s2 + $0x20] sm:$0xff]  ;;  %v372_v31 = vld [vmem:[%s1137_s2 + $0x10] sm:$0xff]  ;;  %v371_v32 = vld [vmem:[%s1137_s2 + $0x8] sm:$0xff] }
  0x20   : > { %693 = vmatpush3.msra.mxu1 %v381_v22  ;;  %v370_v33 = vld [vmem:[%s1137_s2] sm:$0xff] }
  0x21   : > { %694 = vmatprep.subr.mxu1 %v865_v0 }
  0x22   : > { %654 = vmatpush3.xpose.msk.msra.mxu0 %vm224_vm1, %v220_v3  ;;  %695 = vmatpush3.msra.mxu1 %v380_v23 }
  0x23   : > { %655 = vmatprep.subr.mxu0 %v865_v0  ;;  %696 = vmatprep.subr.mxu1 %v865_v0 }
  0x24   : > { %697 = vmatpush3.msra.mxu1 %v379_v24 }
  0x25   : > { %698 = vmatprep.subr.mxu1 %v865_v0 }
  0x26   : > { %656 = vmatpush3.xpose.msk.msra.mxu0 %vm224_vm1, %v219_v4  ;;  %699 = vmatpush3.msra.mxu1 %v378_v25 }
  0x27   : > { %657 = vmatprep.subr.mxu0 %v865_v0  ;;  %700 = vmatprep.subr.mxu1 %v865_v0 }
  0x28   : > { %701 = vmatpush3.msra.mxu1 %v377_v26 }
  0x29   : > { %702 = vmatprep.subr.mxu1 %v865_v0 }
  0x2a   : > { %658 = vmatpush3.xpose.msk.msra.mxu0 %vm224_vm1, %v218_v5  ;;  %703 = vmatpush3.msra.mxu1 %v376_v27 }
  0x2b   : > { %659 = vmatprep.subr.mxu0 %v865_v0  ;;  %704 = vmatprep.subr.mxu1 %v865_v0 }
  0x2c   : > { %705 = vmatpush3.msra.mxu1 %v375_v28 }
  0x2d   : > { %706 = vmatprep.subr.mxu1 %v865_v0 }
  0x2e   : > { %660 = vmatpush3.xpose.msk.msra.mxu0 %vm224_vm1, %v217_v6  ;;  %707 = vmatpush3.msra.mxu1 %v374_v29 }
  0x2f   : > { %661 = vmatprep.subr.mxu0 %v865_v0  ;;  %708 = vmatprep.subr.mxu1 %v865_v0 }
  0x30   : > { %709 = vmatpush3.msra.mxu1 %v373_v30 }
  0x31   : > { %710 = vmatprep.subr.mxu1 %v865_v0 }
  0x32   : > { %662 = vmatpush3.xpose.msk.msra.mxu0 %vm224_vm1, %v216_v7  ;;  %711 = vmatpush3.msra.mxu1 %v372_v31 }
  0x33   : > { %663 = vmatprep.subr.mxu0 %v865_v0  ;;  %712 = vmatprep.subr.mxu1 %v865_v0 }
  0x34   : > { %713 = vmatpush3.msra.mxu1 %v371_v32 }
  0x35   : > { %714 = vmatprep.subr.mxu1 %v865_v0 }
  0x36   : > { %664 = vmatpush3.xpose.msk.msra.mxu0 %vm224_vm1, %v215_v8  ;;  %715 = vmatpush3.msra.mxu1 %v370_v33 }
  0x37   : > { %665 = vmatprep.subr.mxu0 %v865_v0 }
  0x3a   : > { %666 = vmatpush3.xpose.msk.msra.mxu0 %vm224_vm1, %v214_v9 }
  0x3b   : > { %667 = vmatprep.subr.mxu0 %v865_v0 }
  0x3e   : > { %668 = vmatpush3.xpose.msk.msra.mxu0 %vm224_vm1, %v213_v10 }
  0x3f   : > { %669 = vmatprep.subr.mxu0 %v865_v0 }
  0x42   : > { %670 = vmatpush3.xpose.msk.msra.mxu0 %vm224_vm1, %v212_v11 }
  0x43   : > { %671 = vmatprep.subr.mxu0 %v865_v0 }
  0x46   : > { %672 = vmatpush3.xpose.msk.msra.mxu0 %vm224_vm1, %v211_v12 }
  0x47   : > { %673 = vmatprep.subr.mxu0 %v865_v0 }
  0x4a   : > { %674 = vmatpush3.xpose.msk.msra.mxu0 %vm224_vm1, %v210_v13 }
  0x4b   : > { %675 = vmatprep.subr.mxu0 %v865_v0 }
  0x4e   : > { %676 = vmatpush3.xpose.msk.msra.mxu0 %vm224_vm1, %v209_v14 }
  0x4f   : > { %677 = vmatprep.subr.mxu0 %v865_v0 }
  0x52   : > { %678 = vmatpush3.xpose.msk.msra.mxu0 %vm224_vm1, %v208_v15 }
  0x53   : > { %679 = vmatprep.subr.mxu0 %v865_v0 }
  0x56   : > { %680 = vmatpush3.xpose.msk.msra.mxu0 %vm224_vm1, %v207_v16 }
  0x59   : > { %682 = vmatmul.mubr.msk.f32.vlgmr.msra.gmra.mxu0 %vm224_vm1, %v223_v17 }
 0x119   : > { %v342_v34 = vpop.f32.mrf.mxu0 }
 0x11a   : > { %v346_v35 = vrot.slane %v342_v34, 4 }
 0x11b   : > { %v683_v36 = vpop.f32.mrf.mxu0 }
 0x11c   : > { %v347_v37 = vmax.f32 %v342_v34, %v346_v35 }
 0x11e   : > { %v348_v38 = vrot.slane %v347_v37, 2 }
 0x120   : > { %v349_v39 = vmax.f32 %v347_v37, %v348_v38 }
 0x122   : > { %v350_v40 = vrot.slane %v349_v39, 1 }
 0x124   : > { %v351_v41 = vmax.f32 %v349_v39, %v350_v40 }
 0x126   : > { %v352_v42 = vsub.f32 %v342_v34, %v351_v41 }
 0x128   : > { %v353_v43 = vmul.f32 1.442695, %v352_v42 }
 0x12a   : > { %765 = vpow2.f32 %v353_v43 }
 0x137   : > { %v766_v44 = vpop.eup %765 }
 0x138   : > { %v355_v45 = vrot.slane %v766_v44, 4 }
 0x13a   : > { %v356_v46 = vadd.f32 %v766_v44, %v355_v45 }
 0x13c   : > { %v357_v47 = vrot.slane %v356_v46, 2 }
 0x13e   : > { %v358_v48 = vadd.f32 %v357_v47, %v356_v46 }
 0x140   : > { %v359_v49 = vrot.slane %v358_v48, 1 }
 0x142   : > { %v360_v50 = vadd.f32 %v359_v49, %v358_v48 }
 0x144   : > { %767 = vrcp.f32 %v360_v50 }
 0x145   : > { %769 = vlog2.f32 %v360_v50 }
 0x151   : > { %v768_v51 = vpop.eup %767 }
 0x152   : > { %v770_v52 = vpop.eup %769  ;;  %v362_v53 = vmul.f32 %v768_v51, %v360_v50 }
 0x153   : > { %v368_v54 = vmul.f32 0.6931472, %v770_v52 }
 0x154   : > { %v363_v55 = vsub.f32 2.0, %v362_v53 }
 0x155   : > { %v369_v56 = vsub.f32 %v352_v42, %v368_v54 }
 0x156   : > { %v364_v57 = vmul.f32 %v768_v51, %v363_v55 }
 0x157   : > { %717 = vmatmul.mubr.f32.vlgmr.msra.gmra.mxu1 %v369_v56 }
 0x158   : > { %v365_v58 = vmul.f32 %v766_v44, %v364_v57 }
 0x15a   : > { %366 = vst [vmem:[%s194_s8] sm:$0xff] %v365_v58 }
 0x15b   : > { %786 = shalt.err (!%p783_p3)
}
 0x15c   : > { %s787_s28 = scalar_lea.hbm %s477_s12, 128  ;;  %s791_s5 = scalar_lea.hbm %s1138_s3, 256 }
 0x15d   : > { %p788_p4 = scmp.ne.s32.totalorder %s477_s12, %s787_s28  ;;  %p792_p9 = scmp.lt.s32.totalorder %s477_s12, %s1138_s3 }
 0x15e   : > { %p793_p10 = scmp.lt.s32.totalorder %s791_s5, %s787_s28 }
 0x15f   : > { %p789_p7 = pnand %p788_p4, %p932_p5 }
 0x160   : > { %p794_p11 = por %p793_p10, %p792_p9 }
 0x161   : > { %p790_p8 = pneg %p789_p7 }
 0x163   : > { %p795_p12 = pnand %p794_p11, %p790_p8 }
 0x165   : > { %798 = shalt.err (!%p795_p12)
}
 0x166   : > { %719 = dma.vmem_to_hbm [thread:$0]  (%p932_p5), %s480_s13, 128, %s477_s12, %s461_s14   ;;  %vm458_vm2 = vcmask 130048  }
 0x167   : > { %s201_s11 = scalar_lea.vmem [#allocation4], %s587_s7  ;;  %s1099_s27 = scalar_lea.hbm %s1139_s4, %s610_s9 }
 0x168   : > { %s492_s20 = sshll.u32 %s201_s11, 4  ;;  %s466_s28 = scalar_lea.sflag [#allocation5], %s1068_s6  ;;  %s493_s20 = int_to_ptr.vmem [resolvable:$true] %s492_s20 }
 0x169   : > { %s799_s29 = scalar_lea.vmem %s493_s20, 128  ;;  %s868_s12 = smov [#allocation4]  }
 0x16a   : > { %p800_p13 = scmp.ne.s32.totalorder %s493_s20, %s799_s29  ;;  %s803_s13 = sshll.u32 %s868_s12, 4  ;;  %s804_s13 = int_to_ptr.vmem [resolvable:$false] %s803_s13 }
 0x16b   : > { %s805_s7 = scalar_lea.vmem %s804_s13, 256  ;;  %p806_p2 = scmp.lt.s32.totalorder %s493_s20, %s804_s13 }
 0x16c   : > { %p801_p0 = pnand %p800_p13, %p932_p5  ;;  %p807_p3 = scmp.lt.s32.totalorder %s805_s7, %s799_s29 }
 0x16e   : > { %p802_p1 = pneg %p801_p0  ;;  %p808_p4 = por %p807_p3, %p806_p2 }
 0x170   : > { %p809_p7 = pnand %p808_p4, %p802_p1 }
 0x217   : > { %v452_v59 = vpop.f32.mrf.mxu1 }
 0x218   : > { %v456_v60 = vmul.f32 1.442695, %v452_v59 }
 0x219   : > { %v718_v61 = vpop.f32.mrf.mxu1 }
 0x21a   : > { %771 = vpow2.f32 %v456_v60 }
 0x227   : > { %v772_v62 = vpop.eup %771 }
 0x228   : > { %459 = vst.msk [vmem:[%s201_s11] sm:$0xff] %vm458_vm2, %v772_v62 }
 0x229   : > { %812 = shalt.err (!%p809_p7)
}
 0x22a   : > { %s813_s19 = scalar_lea.hbm %s1099_s27, 128  ;;  %s817_s14 = scalar_lea.hbm %s1139_s4, 256 }
 0x22b   : > { %p814_p8 = scmp.ne.s32.totalorder %s1099_s27, %s813_s19  ;;  %p818_p11 = scmp.lt.s32.totalorder %s1099_s27, %s1139_s4 }
 0x22c   : > { %p819_p12 = scmp.lt.s32.totalorder %s817_s14, %s813_s19 }
 0x22d   : > { %p815_p9 = pnand %p814_p8, %p932_p5 }
 0x22e   : > { %p820_p13 = por %p819_p12, %p818_p11 }
 0x22f   : > { %p816_p10 = pneg %p815_p9 }
 0x231   : > { %p821_p0 = pnand %p820_p13, %p816_p10 }
 0x233   : > { %824 = shalt.err (!%p821_p0)
}
 0x234   : > { %720 = dma.vmem_to_hbm [thread:$0]  (%p932_p5), %s493_s20, 128, %s1099_s27, %s466_s28  }
 0x235 PF: > { %p730_p1 = scmp.ge.s32.totalorder %s863_s18, 2  ;;  %s504_s8 = sand.u32 1, %s851_s15  }
 0x236   : > { %s505_s10 = scalar_lea.sflag [#allocation3], %s504_s8 }
 0x237   : > { %p724_p2 = pnand %p730_p1, %p936_p6 }
 0x239   : > { %p725_p3 = pneg %p724_p2 }
 0x23b   : > { %842 = dma.done.wait (%p725_p3), %s505_s10, 128  }
 0x23c   : > { %844 = vsyncadd (%p725_p3), %s505_s10, 4294967168  ;;  %s514_s11 = scalar_lea.sflag [#allocation5], %s504_s8 }
 0x23d   : > { %846 = dma.done.wait (%p725_p3), %s514_s11, 128  }
 0x23e   : > { %848 = vsyncadd (%p725_p3), %s514_s11, 4294967168  ;;  %p18_p5 = scmp.ge.s32.totalorder %s919_s21, 4   ;;  %s1142_s15 = smov %s855_s16 }
 0x23f   : > { %s1143_s16 = smov %s859_s17  ;;  %s1144_s17 = smov %s930_s24 }
 0x240   : > { %s1145_s18 = smov %s919_s21  ;;  %20 = sbr.rel (!%p18_p5) target bundleno = 5 (0x5), region = 84 }
 0x245   :  { %519 = vsyncpa [#allocation3], 1 }
 0x246   :  { %521 = vsyncpa [#allocation3 + $0x1], 1 }
 0x247   :  { %522 = vsyncpa [#allocation5], 1 }
 0x248   :  { %524 = vsyncpa [#allocation5 + $0x1], 1 }

</bundles_post_ra>
